<compile_context>
chip_gen: v6e
topology: v6e:2x2x1
jax: 0.10.0
libtpu: 0.0.40
codegen_flags: <defaults>
</compile_context>

<pallas_src>
import functools

import numpy as np
import jax
import jax.numpy as jnp
from jax.experimental import pallas as pl
from jax.experimental.pallas import tpu as pltpu


def _round_up(x, m):
    return ((x + m - 1) // m) * m


# -----------------------------------------------------------------------------
# Parameter construction + conv/BN folding
# -----------------------------------------------------------------------------
def make_conv_bn_params(key, cin, cout):
    """Deterministic params matching Conv2d(cin,cout,3,pad=1)+BatchNorm2d(cout)."""
    kw, kb, kg, kbe, km, kv = jax.random.split(key, 6)
    w = jax.random.normal(kw, (cout, cin, 3, 3), jnp.float32) * 0.1
    b = jax.random.normal(kb, (cout,), jnp.float32) * 0.1
    gamma = 1.0 + 0.1 * jax.random.normal(kg, (cout,), jnp.float32)
    beta = 0.1 * jax.random.normal(kbe, (cout,), jnp.float32)
    mean = 0.1 * jax.random.normal(km, (cout,), jnp.float32)
    var = 1.0 + 0.1 * jax.random.uniform(kv, (cout,), jnp.float32)
    return w, b, gamma, beta, mean, var


def fold_conv_bn(w, b, gamma, beta, mean, var, *, cin_p, cout_p, eps=1e-5,
                 compute_dtype=jnp.bfloat16):
    """Fold conv bias + eval-mode BN into per-tap weights + bias column.

    Returns:
      w_taps: (9, cout_p, cin_p) compute_dtype, w_taps[k, o, c] = scale[o]*w[o,c,ky,kx]
              with k = ky*3 + kx (matches the tap order built in the kernel).
      b_col : (cout_p, 1) float32, scale*(conv_bias - mean) + beta.
    """
    cout, cin = w.shape[0], w.shape[1]
    scale = gamma / jnp.sqrt(var + eps)                     # (cout,)
    bias = scale * (b - mean) + beta                        # (cout,)
    w_s = w * scale[:, None, None, None]                    # (cout, cin, 3, 3)
    w_t = jnp.transpose(w_s, (2, 3, 0, 1))                  # [ky, kx, o, c]
    w_t = jnp.pad(w_t, ((0, 0), (0, 0), (0, cout_p - cout), (0, cin_p - cin)))
    w_taps = w_t.reshape(9, cout_p, cin_p).astype(compute_dtype)
    b_col = jnp.pad(bias, (0, cout_p - cout)).reshape(cout_p, 1)
    return w_taps, b_col


def _tap_geometry(H, W):
    """Static per-tap lane shifts (jnp.roll convention) + 0/1 border masks."""
    HW = H * W
    ys, xs = np.divmod(np.arange(HW), W)
    shifts, masks, trivial = [], [], []
    for k in range(9):
        ky, kx = divmod(k, 3)
        oy, ox = ky - 1, kx - 1
        d = oy * W + ox                                     # tap source = pixel p + d
        shifts.append((-d) % HW)
        valid = ((ys + oy >= 0) & (ys + oy < H) &
                 (xs + ox >= 0) & (xs + ox < W))
        masks.append(valid.astype(np.float32))
        trivial.append(bool(valid.all()))                   # True only for center tap
    return shifts, np.stack(masks).reshape(9, 1, HW), trivial


def _pick_vmem_limit_bytes():
    # ~100 MiB on v5e/v6e (128 MiB physical), ~54 MiB on v7x (64 MiB physical).
    try:
        cap = int(pltpu.get_tpu_info().vmem_capacity_bytes)
        return min(100 * 1024 * 1024, int(cap * 0.85))
    except Exception:
        return 32 * 1024 * 1024


# -----------------------------------------------------------------------------
# Fused double_conv forward (single pallas_call, intermediate stays in VMEM)
# -----------------------------------------------------------------------------
@functools.partial(jax.jit, static_argnames=("cout",))
def inconv_forward(x_nchw, w1, b1, w2, b2, *, cout):
    N, cin, H, W = x_nchw.shape
    HW = H * W
    _, cout_p, cin_p = w1.shape
    assert HW % 128 == 0, "H*W must be a multiple of 128 (lane-dense layout)"

    x_flat = x_nchw.reshape(N, cin, HW)                     # metadata only
    if cin_p != cin:
        x_flat = jnp.pad(x_flat, ((0, 0), (0, cin_p - cin), (0, 0)))

    shifts, masks_np, trivial = _tap_geometry(H, W)
    masks = jnp.asarray(masks_np)                           # (9, 1, HW) f32 input

    def conv_bn_relu(x, m_ref, w_ref, b_ref, n_out):
        # Per-tap K-loop: 9 small MXU matmuls accumulated in f32 (no im2col buffer).
        acc = jnp.zeros((n_out, HW), jnp.float32)
        for k in range(9):
            tap = x if shifts[k] == 0 else pltpu.roll(x, shifts[k], axis=1)
            if not trivial[k]:
                tap = tap * m_ref[k]                        # mask in f32 (v5e: no bf16 VPU)
            acc = acc + jnp.dot(w_ref[k], tap.astype(w_ref.dtype),
                                preferred_element_type=jnp.float32)
        return jnp.maximum(acc + b_ref[...], 0.0)           # folded bias+BN, ReLU in f32

    def kernel(x_ref, m_ref, w1_ref, b1_ref, w2_ref, b2_ref, o_ref, h1_ref):
        # Stage 1: conv+bn+relu; intermediate kept in a named VMEM scratch.
        h1_ref[...] = conv_bn_relu(x_ref[0], m_ref, w1_ref, b1_ref, cout_p)
        # Stage 2 reads h1 from VMEM (never round-trips HBM); lane-dense store.
        o_ref[0] = conv_bn_relu(h1_ref[...], m_ref, w2_ref, b2_ref,
                                cout_p).astype(o_ref.dtype)

    flops = N * 2 * HW * cout_p * 9 * (cin_p + cout_p)      # both stages
    bytes_accessed = (x_flat.size * 4 + masks.size * 4
                      + w1.size * 2 + w2.size * 2 + b1.size * 4 + b2.size * 4
                      + N * cout_p * HW * 4)

    out_flat = pl.pallas_call(
        kernel,
        out_shape=jax.ShapeDtypeStruct((N, cout_p, HW), jnp.float32),
        grid=(N,),
        in_specs=[
            pl.BlockSpec((1, cin_p, HW), lambda n: (n, 0, 0)),       # x (per image)
            pl.BlockSpec((9, 1, HW), lambda n: (0, 0, 0)),           # border masks
            pl.BlockSpec((9, cout_p, cin_p), lambda n: (0, 0, 0)),   # stage-1 weights (bf16)
            pl.BlockSpec((cout_p, 1), lambda n: (0, 0)),             # stage-1 bias (f32)
            pl.BlockSpec((9, cout_p, cout_p), lambda n: (0, 0, 0)),  # stage-2 weights (bf16)
            pl.BlockSpec((cout_p, 1), lambda n: (0, 0)),             # stage-2 bias (f32)
        ],
        out_specs=pl.BlockSpec((1, cout_p, HW), lambda n: (n, 0, 0)),
        scratch_shapes=[pltpu.VMEM((cout_p, HW), jnp.float32)],      # h1 intermediate
        compiler_params=pltpu.CompilerParams(
            dimension_semantics=("parallel",),                        # v7x: batch over 2 TCs
            vmem_limit_bytes=_pick_vmem_limit_bytes()),
        cost_estimate=pl.CostEstimate(flops=flops, transcendentals=0,
                                      bytes_accessed=bytes_accessed),
    )(x_flat, masks, w1, b1, w2, b2)

    return out_flat[:, :cout, :].reshape(N, cout, H, W)     # slice pad rows + metadata reshape


# -----------------------------------------------------------------------------
# Pure-JAX reference (PyTorch eval-mode semantics) + test harness
# -----------------------------------------------------------------------------
def _reference_conv_bn_relu(x_nchw, w, b, gamma, beta, mean, var, eps=1e-5):
    y = jax.lax.conv_general_dilated(
        x_nchw, w, window_strides=(1, 1), padding=((1, 1), (1, 1)),
        dimension_numbers=("NCHW", "OIHW", "NCHW"))
    y = y + b[None, :, None, None]
    y = (y - mean[None, :, None, None]) / jnp.sqrt(var + eps)[None, :, None, None]
    y = y * gamma[None, :, None, None] + beta[None, :, None, None]
    return jnp.maximum(y, 0.0)


if __name__ == "__main__":
    N, Cin, H, W = 2, 4, 16, 16
    Cout = 8
    Cin_p = _round_up(Cin, 8)         # contraction pad to sublane multiple (not 128)
    Cout_p = _round_up(Cout, 8)       # matmul M pad to sublane multiple

    key = jax.random.PRNGKey(0)
    kx, k1, k2 = jax.random.split(key, 3)
    x = jax.random.normal(kx, (N, Cin, H, W), jnp.float32)

    p1 = make_conv_bn_params(k1, Cin, Cout)
    p2 = make_conv_bn_params(k2, Cout, Cout)
    w1, b1 = fold_conv_bn(*p1, cin_p=Cin_p, cout_p=Cout_p)
    w2, b2 = fold_conv_bn(*p2, cin_p=Cout_p, cout_p=Cout_p)

    out = inconv_forward(x, w1, b1, w2, b2, cout=Cout)
    out = jax.block_until_ready(out)

    ref = _reference_conv_bn_relu(x, *p1)
    ref = _reference_conv_bn_relu(ref, *p2)

    assert out.shape == (N, Cout, H, W)
    err = float(jnp.max(jnp.abs(out - ref)))
    # bf16 MXU operands with f32 accumulation -> tolerance loosened vs pure f32.
    assert jnp.allclose(out, ref, atol=2e-2, rtol=2e-2), f"max abs err {err}"

    print("KERNEL_OK")
</pallas_src>

<mosaic_0001>
module attributes {stable_mosaic.version = 11 : i64} {
  func.func @kernel(%arg0: i32, %arg1: memref<1x8x256xf32, #tpu.memory_space<vmem>>, %arg2: memref<9x1x256xf32, #tpu.memory_space<vmem>>, %arg3: memref<9x8x8xbf16, #tpu.memory_space<vmem>>, %arg4: memref<8x1xf32, #tpu.memory_space<vmem>>, %arg5: memref<9x8x8xbf16, #tpu.memory_space<vmem>>, %arg6: memref<8x1xf32, #tpu.memory_space<vmem>>, %arg7: memref<1x8x256xf32, #tpu.memory_space<vmem>>, %arg8: memref<8x256xf32, #tpu.memory_space<vmem>>) attributes {dimension_semantics = [#tpu.dimension_semantics<parallel>], iteration_bounds = array<i64: 2>, scalar_prefetch = 0 : i64, scratch_operands = 1 : i64, tpu.core_type = #tpu.core_type<tc>, window_params = [{transform_indices = @transform_0, window_bounds = array<i64: 1, 8, 256>}, {pipeline_mode = #tpu.pipeline_mode<synchronous>, transform_indices = @transform_1, window_bounds = array<i64: 9, 1, 256>}, {pipeline_mode = #tpu.pipeline_mode<synchronous>, transform_indices = @transform_2, window_bounds = array<i64: 9, 8, 8>}, {pipeline_mode = #tpu.pipeline_mode<synchronous>, transform_indices = @transform_3, window_bounds = array<i64: 8, 1>}, {pipeline_mode = #tpu.pipeline_mode<synchronous>, transform_indices = @transform_4, window_bounds = array<i64: 9, 8, 8>}, {pipeline_mode = #tpu.pipeline_mode<synchronous>, transform_indices = @transform_5, window_bounds = array<i64: 8, 1>}, {transform_indices = @transform_6, window_bounds = array<i64: 1, 8, 256>}]} {
    %c0 = arith.constant 0 : index
    %c0_0 = arith.constant 0 : index
    %c0_1 = arith.constant 0 : index
    %0 = vector.load %arg1[%c0, %c0_0, %c0_1] : memref<1x8x256xf32, #tpu.memory_space<vmem>>, vector<1x8x256xf32>
    %1 = vector.shape_cast %0 : vector<1x8x256xf32> to vector<8x256xf32>
    %cst = arith.constant 0.000000e+00 : f32
    %2 = vector.broadcast %cst : f32 to vector<8x256xf32>
    %c17_i32 = arith.constant 17 : i32
    %3 = tpu.dynamic_rotate %1 by %c17_i32 dim 1 : vector<8x256xf32>, i32 -> vector<8x256xf32>
    %c0_2 = arith.constant 0 : index
    %c0_3 = arith.constant 0 : index
    %c0_4 = arith.constant 0 : index
    %4 = vector.load %arg2[%c0_2, %c0_3, %c0_4] : memref<9x1x256xf32, #tpu.memory_space<vmem>>, vector<1x1x256xf32>
    %5 = vector.shape_cast %4 : vector<1x1x256xf32> to vector<1x256xf32>
    %6 = vector.broadcast %5 : vector<1x256xf32> to vector<8x256xf32>
    %7 = arith.mulf %3, %6 : vector<8x256xf32>
    %c0_5 = arith.constant 0 : index
    %c0_6 = arith.constant 0 : index
    %c0_7 = arith.constant 0 : index
    %8 = vector.load %arg3[%c0_5, %c0_6, %c0_7] : memref<9x8x8xbf16, #tpu.memory_space<vmem>>, vector<1x8x8xbf16>
    %9 = vector.shape_cast %8 : vector<1x8x8xbf16> to vector<8x8xbf16>
    %10 = arith.truncf %7 : vector<8x256xf32> to vector<8x256xbf16>
    %cst_8 = arith.constant dense<0.000000e+00> : vector<8x256xf32>
    %11 = tpu.matmul %9, %10, %cst_8 {dimension_numbers = #tpu.dot_dimension_numbers<[1], [0], [0], [1], [0, 0, 1, 1], [], []>} : vector<8x8xbf16>, vector<8x256xbf16>, vector<8x256xf32> -> vector<8x256xf32>
    %12 = arith.addf %2, %11 : vector<8x256xf32>
    %c16_i32 = arith.constant 16 : i32
    %13 = tpu.dynamic_rotate %1 by %c16_i32 dim 1 : vector<8x256xf32>, i32 -> vector<8x256xf32>
    %c1 = arith.constant 1 : index
    %c0_9 = arith.constant 0 : index
    %c0_10 = arith.constant 0 : index
    %14 = vector.load %arg2[%c1, %c0_9, %c0_10] : memref<9x1x256xf32, #tpu.memory_space<vmem>>, vector<1x1x256xf32>
    %15 = vector.shape_cast %14 : vector<1x1x256xf32> to vector<1x256xf32>
    %16 = vector.broadcast %15 : vector<1x256xf32> to vector<8x256xf32>
    %17 = arith.mulf %13, %16 : vector<8x256xf32>
    %c1_11 = arith.constant 1 : index
    %c0_12 = arith.constant 0 : index
    %c0_13 = arith.constant 0 : index
    %18 = vector.load %arg3[%c1_11, %c0_12, %c0_13] : memref<9x8x8xbf16, #tpu.memory_space<vmem>>, vector<1x8x8xbf16>
    %19 = vector.shape_cast %18 : vector<1x8x8xbf16> to vector<8x8xbf16>
    %20 = arith.truncf %17 : vector<8x256xf32> to vector<8x256xbf16>
    %cst_14 = arith.constant dense<0.000000e+00> : vector<8x256xf32>
    %21 = tpu.matmul %19, %20, %cst_14 {dimension_numbers = #tpu.dot_dimension_numbers<[1], [0], [0], [1], [0, 0, 1, 1], [], []>} : vector<8x8xbf16>, vector<8x256xbf16>, vector<8x256xf32> -> vector<8x256xf32>
    %22 = arith.addf %12, %21 : vector<8x256xf32>
    %c15_i32 = arith.constant 15 : i32
    %23 = tpu.dynamic_rotate %1 by %c15_i32 dim 1 : vector<8x256xf32>, i32 -> vector<8x256xf32>
    %c2 = arith.constant 2 : index
    %c0_15 = arith.constant 0 : index
    %c0_16 = arith.constant 0 : index
    %24 = vector.load %arg2[%c2, %c0_15, %c0_16] : memref<9x1x256xf32, #tpu.memory_space<vmem>>, vector<1x1x256xf32>
    %25 = vector.shape_cast %24 : vector<1x1x256xf32> to vector<1x256xf32>
    %26 = vector.broadcast %25 : vector<1x256xf32> to vector<8x256xf32>
    %27 = arith.mulf %23, %26 : vector<8x256xf32>
    %c2_17 = arith.constant 2 : index
    %c0_18 = arith.constant 0 : index
    %c0_19 = arith.constant 0 : index
    %28 = vector.load %arg3[%c2_17, %c0_18, %c0_19] : memref<9x8x8xbf16, #tpu.memory_space<vmem>>, vector<1x8x8xbf16>
    %29 = vector.shape_cast %28 : vector<1x8x8xbf16> to vector<8x8xbf16>
    %30 = arith.truncf %27 : vector<8x256xf32> to vector<8x256xbf16>
    %cst_20 = arith.constant dense<0.000000e+00> : vector<8x256xf32>
    %31 = tpu.matmul %29, %30, %cst_20 {dimension_numbers = #tpu.dot_dimension_numbers<[1], [0], [0], [1], [0, 0, 1, 1], [], []>} : vector<8x8xbf16>, vector<8x256xbf16>, vector<8x256xf32> -> vector<8x256xf32>
    %32 = arith.addf %22, %31 : vector<8x256xf32>
    %c1_i32 = arith.constant 1 : i32
    %33 = tpu.dynamic_rotate %1 by %c1_i32 dim 1 : vector<8x256xf32>, i32 -> vector<8x256xf32>
    %c3 = arith.constant 3 : index
    %c0_21 = arith.constant 0 : index
    %c0_22 = arith.constant 0 : index
    %34 = vector.load %arg2[%c3, %c0_21, %c0_22] : memref<9x1x256xf32, #tpu.memory_space<vmem>>, vector<1x1x256xf32>
    %35 = vector.shape_cast %34 : vector<1x1x256xf32> to vector<1x256xf32>
    %36 = vector.broadcast %35 : vector<1x256xf32> to vector<8x256xf32>
    %37 = arith.mulf %33, %36 : vector<8x256xf32>
    %c3_23 = arith.constant 3 : index
    %c0_24 = arith.constant 0 : index
    %c0_25 = arith.constant 0 : index
    %38 = vector.load %arg3[%c3_23, %c0_24, %c0_25] : memref<9x8x8xbf16, #tpu.memory_space<vmem>>, vector<1x8x8xbf16>
    %39 = vector.shape_cast %38 : vector<1x8x8xbf16> to vector<8x8xbf16>
    %40 = arith.truncf %37 : vector<8x256xf32> to vector<8x256xbf16>
    %cst_26 = arith.constant dense<0.000000e+00> : vector<8x256xf32>
    %41 = tpu.matmul %39, %40, %cst_26 {dimension_numbers = #tpu.dot_dimension_numbers<[1], [0], [0], [1], [0, 0, 1, 1], [], []>} : vector<8x8xbf16>, vector<8x256xbf16>, vector<8x256xf32> -> vector<8x256xf32>
    %42 = arith.addf %32, %41 : vector<8x256xf32>
    %c4 = arith.constant 4 : index
    %c0_27 = arith.constant 0 : index
    %c0_28 = arith.constant 0 : index
    %43 = vector.load %arg3[%c4, %c0_27, %c0_28] : memref<9x8x8xbf16, #tpu.memory_space<vmem>>, vector<1x8x8xbf16>
    %44 = vector.shape_cast %43 : vector<1x8x8xbf16> to vector<8x8xbf16>
    %45 = arith.truncf %1 : vector<8x256xf32> to vector<8x256xbf16>
    %cst_29 = arith.constant dense<0.000000e+00> : vector<8x256xf32>
    %46 = tpu.matmul %44, %45, %cst_29 {dimension_numbers = #tpu.dot_dimension_numbers<[1], [0], [0], [1], [0, 0, 1, 1], [], []>} : vector<8x8xbf16>, vector<8x256xbf16>, vector<8x256xf32> -> vector<8x256xf32>
    %47 = arith.addf %42, %46 : vector<8x256xf32>
    %c255_i32 = arith.constant 255 : i32
    %48 = tpu.dynamic_rotate %1 by %c255_i32 dim 1 : vector<8x256xf32>, i32 -> vector<8x256xf32>
    %c5 = arith.constant 5 : index
    %c0_30 = arith.constant 0 : index
    %c0_31 = arith.constant 0 : index
    %49 = vector.load %arg2[%c5, %c0_30, %c0_31] : memref<9x1x256xf32, #tpu.memory_space<vmem>>, vector<1x1x256xf32>
    %50 = vector.shape_cast %49 : vector<1x1x256xf32> to vector<1x256xf32>
    %51 = vector.broadcast %50 : vector<1x256xf32> to vector<8x256xf32>
    %52 = arith.mulf %48, %51 : vector<8x256xf32>
    %c5_32 = arith.constant 5 : index
    %c0_33 = arith.constant 0 : index
    %c0_34 = arith.constant 0 : index
    %53 = vector.load %arg3[%c5_32, %c0_33, %c0_34] : memref<9x8x8xbf16, #tpu.memory_space<vmem>>, vector<1x8x8xbf16>
    %54 = vector.shape_cast %53 : vector<1x8x8xbf16> to vector<8x8xbf16>
    %55 = arith.truncf %52 : vector<8x256xf32> to vector<8x256xbf16>
    %cst_35 = arith.constant dense<0.000000e+00> : vector<8x256xf32>
    %56 = tpu.matmul %54, %55, %cst_35 {dimension_numbers = #tpu.dot_dimension_numbers<[1], [0], [0], [1], [0, 0, 1, 1], [], []>} : vector<8x8xbf16>, vector<8x256xbf16>, vector<8x256xf32> -> vector<8x256xf32>
    %57 = arith.addf %47, %56 : vector<8x256xf32>
    %c241_i32 = arith.constant 241 : i32
    %58 = tpu.dynamic_rotate %1 by %c241_i32 dim 1 : vector<8x256xf32>, i32 -> vector<8x256xf32>
    %c6 = arith.constant 6 : index
    %c0_36 = arith.constant 0 : index
    %c0_37 = arith.constant 0 : index
    %59 = vector.load %arg2[%c6, %c0_36, %c0_37] : memref<9x1x256xf32, #tpu.memory_space<vmem>>, vector<1x1x256xf32>
    %60 = vector.shape_cast %59 : vector<1x1x256xf32> to vector<1x256xf32>
    %61 = vector.broadcast %60 : vector<1x256xf32> to vector<8x256xf32>
    %62 = arith.mulf %58, %61 : vector<8x256xf32>
    %c6_38 = arith.constant 6 : index
    %c0_39 = arith.constant 0 : index
    %c0_40 = arith.constant 0 : index
    %63 = vector.load %arg3[%c6_38, %c0_39, %c0_40] : memref<9x8x8xbf16, #tpu.memory_space<vmem>>, vector<1x8x8xbf16>
    %64 = vector.shape_cast %63 : vector<1x8x8xbf16> to vector<8x8xbf16>
    %65 = arith.truncf %62 : vector<8x256xf32> to vector<8x256xbf16>
    %cst_41 = arith.constant dense<0.000000e+00> : vector<8x256xf32>
    %66 = tpu.matmul %64, %65, %cst_41 {dimension_numbers = #tpu.dot_dimension_numbers<[1], [0], [0], [1], [0, 0, 1, 1], [], []>} : vector<8x8xbf16>, vector<8x256xbf16>, vector<8x256xf32> -> vector<8x256xf32>
    %67 = arith.addf %57, %66 : vector<8x256xf32>
    %c240_i32 = arith.constant 240 : i32
    %68 = tpu.dynamic_rotate %1 by %c240_i32 dim 1 : vector<8x256xf32>, i32 -> vector<8x256xf32>
    %c7 = arith.constant 7 : index
    %c0_42 = arith.constant 0 : index
    %c0_43 = arith.constant 0 : index
    %69 = vector.load %arg2[%c7, %c0_42, %c0_43] : memref<9x1x256xf32, #tpu.memory_space<vmem>>, vector<1x1x256xf32>
    %70 = vector.shape_cast %69 : vector<1x1x256xf32> to vector<1x256xf32>
    %71 = vector.broadcast %70 : vector<1x256xf32> to vector<8x256xf32>
    %72 = arith.mulf %68, %71 : vector<8x256xf32>
    %c7_44 = arith.constant 7 : index
    %c0_45 = arith.constant 0 : index
    %c0_46 = arith.constant 0 : index
    %73 = vector.load %arg3[%c7_44, %c0_45, %c0_46] : memref<9x8x8xbf16, #tpu.memory_space<vmem>>, vector<1x8x8xbf16>
    %74 = vector.shape_cast %73 : vector<1x8x8xbf16> to vector<8x8xbf16>
    %75 = arith.truncf %72 : vector<8x256xf32> to vector<8x256xbf16>
    %cst_47 = arith.constant dense<0.000000e+00> : vector<8x256xf32>
    %76 = tpu.matmul %74, %75, %cst_47 {dimension_numbers = #tpu.dot_dimension_numbers<[1], [0], [0], [1], [0, 0, 1, 1], [], []>} : vector<8x8xbf16>, vector<8x256xbf16>, vector<8x256xf32> -> vector<8x256xf32>
    %77 = arith.addf %67, %76 : vector<8x256xf32>
    %c239_i32 = arith.constant 239 : i32
    %78 = tpu.dynamic_rotate %1 by %c239_i32 dim 1 : vector<8x256xf32>, i32 -> vector<8x256xf32>
    %c8 = arith.constant 8 : index
    %c0_48 = arith.constant 0 : index
    %c0_49 = arith.constant 0 : index
    %79 = vector.load %arg2[%c8, %c0_48, %c0_49] : memref<9x1x256xf32, #tpu.memory_space<vmem>>, vector<1x1x256xf32>
    %80 = vector.shape_cast %79 : vector<1x1x256xf32> to vector<1x256xf32>
    %81 = vector.broadcast %80 : vector<1x256xf32> to vector<8x256xf32>
    %82 = arith.mulf %78, %81 : vector<8x256xf32>
    %c8_50 = arith.constant 8 : index
    %c0_51 = arith.constant 0 : index
    %c0_52 = arith.constant 0 : index
    %83 = vector.load %arg3[%c8_50, %c0_51, %c0_52] : memref<9x8x8xbf16, #tpu.memory_space<vmem>>, vector<1x8x8xbf16>
    %84 = vector.shape_cast %83 : vector<1x8x8xbf16> to vector<8x8xbf16>
    %85 = arith.truncf %82 : vector<8x256xf32> to vector<8x256xbf16>
    %cst_53 = arith.constant dense<0.000000e+00> : vector<8x256xf32>
    %86 = tpu.matmul %84, %85, %cst_53 {dimension_numbers = #tpu.dot_dimension_numbers<[1], [0], [0], [1], [0, 0, 1, 1], [], []>} : vector<8x8xbf16>, vector<8x256xbf16>, vector<8x256xf32> -> vector<8x256xf32>
    %87 = arith.addf %77, %86 : vector<8x256xf32>
    %c0_54 = arith.constant 0 : index
    %c0_55 = arith.constant 0 : index
    %88 = vector.load %arg4[%c0_54, %c0_55] : memref<8x1xf32, #tpu.memory_space<vmem>>, vector<8x1xf32>
    %89 = vector.broadcast %88 : vector<8x1xf32> to vector<8x256xf32>
    %90 = arith.addf %87, %89 : vector<8x256xf32>
    %cst_56 = arith.constant 0.000000e+00 : f32
    %91 = vector.broadcast %cst_56 : f32 to vector<8x256xf32>
    %92 = arith.maximumf %90, %91 : vector<8x256xf32>
    %c0_57 = arith.constant 0 : index
    %c0_58 = arith.constant 0 : index
    %93 = vector.load %arg8[%c0_57, %c0_58] : memref<8x256xf32, #tpu.memory_space<vmem>>, vector<8x256xf32>
    tpu.vector_store %arg8[%c0_57, %c0_58], %92 {strides = array<i32>} : memref<8x256xf32, #tpu.memory_space<vmem>>, vector<8x256xf32>,
    %c0_59 = arith.constant 0 : index
    %c0_60 = arith.constant 0 : index
    %94 = vector.load %arg8[%c0_59, %c0_60] : memref<8x256xf32, #tpu.memory_space<vmem>>, vector<8x256xf32>
    %cst_61 = arith.constant 0.000000e+00 : f32
    %95 = vector.broadcast %cst_61 : f32 to vector<8x256xf32>
    %c17_i32_62 = arith.constant 17 : i32
    %96 = tpu.dynamic_rotate %94 by %c17_i32_62 dim 1 : vector<8x256xf32>, i32 -> vector<8x256xf32>
    %c0_63 = arith.constant 0 : index
    %c0_64 = arith.constant 0 : index
    %c0_65 = arith.constant 0 : index
    %97 = vector.load %arg2[%c0_63, %c0_64, %c0_65] : memref<9x1x256xf32, #tpu.memory_space<vmem>>, vector<1x1x256xf32>
    %98 = vector.shape_cast %97 : vector<1x1x256xf32> to vector<1x256xf32>
    %99 = vector.broadcast %98 : vector<1x256xf32> to vector<8x256xf32>
    %100 = arith.mulf %96, %99 : vector<8x256xf32>
    %c0_66 = arith.constant 0 : index
    %c0_67 = arith.constant 0 : index
    %c0_68 = arith.constant 0 : index
    %101 = vector.load %arg5[%c0_66, %c0_67, %c0_68] : memref<9x8x8xbf16, #tpu.memory_space<vmem>>, vector<1x8x8xbf16>
    %102 = vector.shape_cast %101 : vector<1x8x8xbf16> to vector<8x8xbf16>
    %103 = arith.truncf %100 : vector<8x256xf32> to vector<8x256xbf16>
    %cst_69 = arith.constant dense<0.000000e+00> : vector<8x256xf32>
    %104 = tpu.matmul %102, %103, %cst_69 {dimension_numbers = #tpu.dot_dimension_numbers<[1], [0], [0], [1], [0, 0, 1, 1], [], []>} : vector<8x8xbf16>, vector<8x256xbf16>, vector<8x256xf32> -> vector<8x256xf32>
    %105 = arith.addf %95, %104 : vector<8x256xf32>
    %c16_i32_70 = arith.constant 16 : i32
    %106 = tpu.dynamic_rotate %94 by %c16_i32_70 dim 1 : vector<8x256xf32>, i32 -> vector<8x256xf32>
    %c1_71 = arith.constant 1 : index
    %c0_72 = arith.constant 0 : index
    %c0_73 = arith.constant 0 : index
    %107 = vector.load %arg2[%c1_71, %c0_72, %c0_73] : memref<9x1x256xf32, #tpu.memory_space<vmem>>, vector<1x1x256xf32>
    %108 = vector.shape_cast %107 : vector<1x1x256xf32> to vector<1x256xf32>
    %109 = vector.broadcast %108 : vector<1x256xf32> to vector<8x256xf32>
    %110 = arith.mulf %106, %109 : vector<8x256xf32>
    %c1_74 = arith.constant 1 : index
    %c0_75 = arith.constant 0 : index
    %c0_76 = arith.constant 0 : index
    %111 = vector.load %arg5[%c1_74, %c0_75, %c0_76] : memref<9x8x8xbf16, #tpu.memory_space<vmem>>, vector<1x8x8xbf16>
    %112 = vector.shape_cast %111 : vector<1x8x8xbf16> to vector<8x8xbf16>
    %113 = arith.truncf %110 : vector<8x256xf32> to vector<8x256xbf16>
    %cst_77 = arith.constant dense<0.000000e+00> : vector<8x256xf32>
    %114 = tpu.matmul %112, %113, %cst_77 {dimension_numbers = #tpu.dot_dimension_numbers<[1], [0], [0], [1], [0, 0, 1, 1], [], []>} : vector<8x8xbf16>, vector<8x256xbf16>, vector<8x256xf32> -> vector<8x256xf32>
    %115 = arith.addf %105, %114 : vector<8x256xf32>
    %c15_i32_78 = arith.constant 15 : i32
    %116 = tpu.dynamic_rotate %94 by %c15_i32_78 dim 1 : vector<8x256xf32>, i32 -> vector<8x256xf32>
    %c2_79 = arith.constant 2 : index
    %c0_80 = arith.constant 0 : index
    %c0_81 = arith.constant 0 : index
    %117 = vector.load %arg2[%c2_79, %c0_80, %c0_81] : memref<9x1x256xf32, #tpu.memory_space<vmem>>, vector<1x1x256xf32>
    %118 = vector.shape_cast %117 : vector<1x1x256xf32> to vector<1x256xf32>
    %119 = vector.broadcast %118 : vector<1x256xf32> to vector<8x256xf32>
    %120 = arith.mulf %116, %119 : vector<8x256xf32>
    %c2_82 = arith.constant 2 : index
    %c0_83 = arith.constant 0 : index
    %c0_84 = arith.constant 0 : index
    %121 = vector.load %arg5[%c2_82, %c0_83, %c0_84] : memref<9x8x8xbf16, #tpu.memory_space<vmem>>, vector<1x8x8xbf16>
    %122 = vector.shape_cast %121 : vector<1x8x8xbf16> to vector<8x8xbf16>
    %123 = arith.truncf %120 : vector<8x256xf32> to vector<8x256xbf16>
    %cst_85 = arith.constant dense<0.000000e+00> : vector<8x256xf32>
    %124 = tpu.matmul %122, %123, %cst_85 {dimension_numbers = #tpu.dot_dimension_numbers<[1], [0], [0], [1], [0, 0, 1, 1], [], []>} : vector<8x8xbf16>, vector<8x256xbf16>, vector<8x256xf32> -> vector<8x256xf32>
    %125 = arith.addf %115, %124 : vector<8x256xf32>
    %c1_i32_86 = arith.constant 1 : i32
    %126 = tpu.dynamic_rotate %94 by %c1_i32_86 dim 1 : vector<8x256xf32>, i32 -> vector<8x256xf32>
    %c3_87 = arith.constant 3 : index
    %c0_88 = arith.constant 0 : index
    %c0_89 = arith.constant 0 : index
    %127 = vector.load %arg2[%c3_87, %c0_88, %c0_89] : memref<9x1x256xf32, #tpu.memory_space<vmem>>, vector<1x1x256xf32>
    %128 = vector.shape_cast %127 : vector<1x1x256xf32> to vector<1x256xf32>
    %129 = vector.broadcast %128 : vector<1x256xf32> to vector<8x256xf32>
    %130 = arith.mulf %126, %129 : vector<8x256xf32>
    %c3_90 = arith.constant 3 : index
    %c0_91 = arith.constant 0 : index
    %c0_92 = arith.constant 0 : index
    %131 = vector.load %arg5[%c3_90, %c0_91, %c0_92] : memref<9x8x8xbf16, #tpu.memory_space<vmem>>, vector<1x8x8xbf16>
    %132 = vector.shape_cast %131 : vector<1x8x8xbf16> to vector<8x8xbf16>
    %133 = arith.truncf %130 : vector<8x256xf32> to vector<8x256xbf16>
    %cst_93 = arith.constant dense<0.000000e+00> : vector<8x256xf32>
    %134 = tpu.matmul %132, %133, %cst_93 {dimension_numbers = #tpu.dot_dimension_numbers<[1], [0], [0], [1], [0, 0, 1, 1], [], []>} : vector<8x8xbf16>, vector<8x256xbf16>, vector<8x256xf32> -> vector<8x256xf32>
    %135 = arith.addf %125, %134 : vector<8x256xf32>
    %c4_94 = arith.constant 4 : index
    %c0_95 = arith.constant 0 : index
    %c0_96 = arith.constant 0 : index
    %136 = vector.load %arg5[%c4_94, %c0_95, %c0_96] : memref<9x8x8xbf16, #tpu.memory_space<vmem>>, vector<1x8x8xbf16>
    %137 = vector.shape_cast %136 : vector<1x8x8xbf16> to vector<8x8xbf16>
    %138 = arith.truncf %94 : vector<8x256xf32> to vector<8x256xbf16>
    %cst_97 = arith.constant dense<0.000000e+00> : vector<8x256xf32>
    %139 = tpu.matmul %137, %138, %cst_97 {dimension_numbers = #tpu.dot_dimension_numbers<[1], [0], [0], [1], [0, 0, 1, 1], [], []>} : vector<8x8xbf16>, vector<8x256xbf16>, vector<8x256xf32> -> vector<8x256xf32>
    %140 = arith.addf %135, %139 : vector<8x256xf32>
    %c255_i32_98 = arith.constant 255 : i32
    %141 = tpu.dynamic_rotate %94 by %c255_i32_98 dim 1 : vector<8x256xf32>, i32 -> vector<8x256xf32>
    %c5_99 = arith.constant 5 : index
    %c0_100 = arith.constant 0 : index
    %c0_101 = arith.constant 0 : index
    %142 = vector.load %arg2[%c5_99, %c0_100, %c0_101] : memref<9x1x256xf32, #tpu.memory_space<vmem>>, vector<1x1x256xf32>
    %143 = vector.shape_cast %142 : vector<1x1x256xf32> to vector<1x256xf32>
    %144 = vector.broadcast %143 : vector<1x256xf32> to vector<8x256xf32>
    %145 = arith.mulf %141, %144 : vector<8x256xf32>
    %c5_102 = arith.constant 5 : index
    %c0_103 = arith.constant 0 : index
    %c0_104 = arith.constant 0 : index
    %146 = vector.load %arg5[%c5_102, %c0_103, %c0_104] : memref<9x8x8xbf16, #tpu.memory_space<vmem>>, vector<1x8x8xbf16>
    %147 = vector.shape_cast %146 : vector<1x8x8xbf16> to vector<8x8xbf16>
    %148 = arith.truncf %145 : vector<8x256xf32> to vector<8x256xbf16>
    %cst_105 = arith.constant dense<0.000000e+00> : vector<8x256xf32>
    %149 = tpu.matmul %147, %148, %cst_105 {dimension_numbers = #tpu.dot_dimension_numbers<[1], [0], [0], [1], [0, 0, 1, 1], [], []>} : vector<8x8xbf16>, vector<8x256xbf16>, vector<8x256xf32> -> vector<8x256xf32>
    %150 = arith.addf %140, %149 : vector<8x256xf32>
    %c241_i32_106 = arith.constant 241 : i32
    %151 = tpu.dynamic_rotate %94 by %c241_i32_106 dim 1 : vector<8x256xf32>, i32 -> vector<8x256xf32>
    %c6_107 = arith.constant 6 : index
    %c0_108 = arith.constant 0 : index
    %c0_109 = arith.constant 0 : index
    %152 = vector.load %arg2[%c6_107, %c0_108, %c0_109] : memref<9x1x256xf32, #tpu.memory_space<vmem>>, vector<1x1x256xf32>
    %153 = vector.shape_cast %152 : vector<1x1x256xf32> to vector<1x256xf32>
    %154 = vector.broadcast %153 : vector<1x256xf32> to vector<8x256xf32>
    %155 = arith.mulf %151, %154 : vector<8x256xf32>
    %c6_110 = arith.constant 6 : index
    %c0_111 = arith.constant 0 : index
    %c0_112 = arith.constant 0 : index
    %156 = vector.load %arg5[%c6_110, %c0_111, %c0_112] : memref<9x8x8xbf16, #tpu.memory_space<vmem>>, vector<1x8x8xbf16>
    %157 = vector.shape_cast %156 : vector<1x8x8xbf16> to vector<8x8xbf16>
    %158 = arith.truncf %155 : vector<8x256xf32> to vector<8x256xbf16>
    %cst_113 = arith.constant dense<0.000000e+00> : vector<8x256xf32>
    %159 = tpu.matmul %157, %158, %cst_113 {dimension_numbers = #tpu.dot_dimension_numbers<[1], [0], [0], [1], [0, 0, 1, 1], [], []>} : vector<8x8xbf16>, vector<8x256xbf16>, vector<8x256xf32> -> vector<8x256xf32>
    %160 = arith.addf %150, %159 : vector<8x256xf32>
    %c240_i32_114 = arith.constant 240 : i32
    %161 = tpu.dynamic_rotate %94 by %c240_i32_114 dim 1 : vector<8x256xf32>, i32 -> vector<8x256xf32>
    %c7_115 = arith.constant 7 : index
    %c0_116 = arith.constant 0 : index
    %c0_117 = arith.constant 0 : index
    %162 = vector.load %arg2[%c7_115, %c0_116, %c0_117] : memref<9x1x256xf32, #tpu.memory_space<vmem>>, vector<1x1x256xf32>
    %163 = vector.shape_cast %162 : vector<1x1x256xf32> to vector<1x256xf32>
    %164 = vector.broadcast %163 : vector<1x256xf32> to vector<8x256xf32>
    %165 = arith.mulf %161, %164 : vector<8x256xf32>
    %c7_118 = arith.constant 7 : index
    %c0_119 = arith.constant 0 : index
    %c0_120 = arith.constant 0 : index
    %166 = vector.load %arg5[%c7_118, %c0_119, %c0_120] : memref<9x8x8xbf16, #tpu.memory_space<vmem>>, vector<1x8x8xbf16>
    %167 = vector.shape_cast %166 : vector<1x8x8xbf16> to vector<8x8xbf16>
    %168 = arith.truncf %165 : vector<8x256xf32> to vector<8x256xbf16>
    %cst_121 = arith.constant dense<0.000000e+00> : vector<8x256xf32>
    %169 = tpu.matmul %167, %168, %cst_121 {dimension_numbers = #tpu.dot_dimension_numbers<[1], [0], [0], [1], [0, 0, 1, 1], [], []>} : vector<8x8xbf16>, vector<8x256xbf16>, vector<8x256xf32> -> vector<8x256xf32>
    %170 = arith.addf %160, %169 : vector<8x256xf32>
    %c239_i32_122 = arith.constant 239 : i32
    %171 = tpu.dynamic_rotate %94 by %c239_i32_122 dim 1 : vector<8x256xf32>, i32 -> vector<8x256xf32>
    %c8_123 = arith.constant 8 : index
    %c0_124 = arith.constant 0 : index
    %c0_125 = arith.constant 0 : index
    %172 = vector.load %arg2[%c8_123, %c0_124, %c0_125] : memref<9x1x256xf32, #tpu.memory_space<vmem>>, vector<1x1x256xf32>
    %173 = vector.shape_cast %172 : vector<1x1x256xf32> to vector<1x256xf32>
    %174 = vector.broadcast %173 : vector<1x256xf32> to vector<8x256xf32>
    %175 = arith.mulf %171, %174 : vector<8x256xf32>
    %c8_126 = arith.constant 8 : index
    %c0_127 = arith.constant 0 : index
    %c0_128 = arith.constant 0 : index
    %176 = vector.load %arg5[%c8_126, %c0_127, %c0_128] : memref<9x8x8xbf16, #tpu.memory_space<vmem>>, vector<1x8x8xbf16>
    %177 = vector.shape_cast %176 : vector<1x8x8xbf16> to vector<8x8xbf16>
    %178 = arith.truncf %175 : vector<8x256xf32> to vector<8x256xbf16>
    %cst_129 = arith.constant dense<0.000000e+00> : vector<8x256xf32>
    %179 = tpu.matmul %177, %178, %cst_129 {dimension_numbers = #tpu.dot_dimension_numbers<[1], [0], [0], [1], [0, 0, 1, 1], [], []>} : vector<8x8xbf16>, vector<8x256xbf16>, vector<8x256xf32> -> vector<8x256xf32>
    %180 = arith.addf %170, %179 : vector<8x256xf32>
    %c0_130 = arith.constant 0 : index
    %c0_131 = arith.constant 0 : index
    %181 = vector.load %arg6[%c0_130, %c0_131] : memref<8x1xf32, #tpu.memory_space<vmem>>, vector<8x1xf32>
    %182 = vector.broadcast %181 : vector<8x1xf32> to vector<8x256xf32>
    %183 = arith.addf %180, %182 : vector<8x256xf32>
    %cst_132 = arith.constant 0.000000e+00 : f32
    %184 = vector.broadcast %cst_132 : f32 to vector<8x256xf32>
    %185 = arith.maximumf %183, %184 : vector<8x256xf32>
    %c0_133 = arith.constant 0 : index
    %c0_134 = arith.constant 0 : index
    %c0_135 = arith.constant 0 : index
    %186 = vector.load %arg7[%c0_133, %c0_134, %c0_135] : memref<1x8x256xf32, #tpu.memory_space<vmem>>, vector<1x8x256xf32>
    %187 = vector.shape_cast %186 : vector<1x8x256xf32> to vector<8x256xf32>
    %188 = vector.shape_cast %185 : vector<8x256xf32> to vector<1x8x256xf32>
    tpu.vector_store %arg7[%c0_133, %c0_134, %c0_135], %188 {strides = array<i32>} : memref<1x8x256xf32, #tpu.memory_space<vmem>>, vector<1x8x256xf32>,
    return
  }
  func.func @transform_0(%arg0: i32) -> (i32, i32, i32) {
    %c0_i32 = arith.constant 0 : i32
    %c0_i32_0 = arith.constant 0 : i32
    %c0_i32_1 = arith.constant 0 : i32
    return %arg0, %c0_i32, %c0_i32_0 : i32, i32, i32
  }
  func.func @transform_1(%arg0: i32) -> (i32, i32, i32) {
    %c0_i32 = arith.constant 0 : i32
    %c0_i32_0 = arith.constant 0 : i32
    %c0_i32_1 = arith.constant 0 : i32
    %c0_i32_2 = arith.constant 0 : i32
    return %c0_i32, %c0_i32_0, %c0_i32_1 : i32, i32, i32
  }
  func.func @transform_2(%arg0: i32) -> (i32, i32, i32) {
    %c0_i32 = arith.constant 0 : i32
    %c0_i32_0 = arith.constant 0 : i32
    %c0_i32_1 = arith.constant 0 : i32
    %c0_i32_2 = arith.constant 0 : i32
    return %c0_i32, %c0_i32_0, %c0_i32_1 : i32, i32, i32
  }
  func.func @transform_3(%arg0: i32) -> (i32, i32) {
    %c0_i32 = arith.constant 0 : i32
    %c0_i32_0 = arith.constant 0 : i32
    %c0_i32_1 = arith.constant 0 : i32
    return %c0_i32, %c0_i32_0 : i32, i32
  }
  func.func @transform_4(%arg0: i32) -> (i32, i32, i32) {
    %c0_i32 = arith.constant 0 : i32
    %c0_i32_0 = arith.constant 0 : i32
    %c0_i32_1 = arith.constant 0 : i32
    %c0_i32_2 = arith.constant 0 : i32
    return %c0_i32, %c0_i32_0, %c0_i32_1 : i32, i32, i32
  }
  func.func @transform_5(%arg0: i32) -> (i32, i32) {
    %c0_i32 = arith.constant 0 : i32
    %c0_i32_0 = arith.constant 0 : i32
    %c0_i32_1 = arith.constant 0 : i32
    return %c0_i32, %c0_i32_0 : i32, i32
  }
  func.func @transform_6(%arg0: i32) -> (i32, i32, i32) {
    %c0_i32 = arith.constant 0 : i32
    %c0_i32_0 = arith.constant 0 : i32
    %c0_i32_1 = arith.constant 0 : i32
    return %arg0, %c0_i32, %c0_i32_0 : i32, i32, i32
  }
}

</mosaic_0001>

<bundles_post_ra>
// kernel: inconv_forward.1
= control target key start
LH: loop header
LB: loop body
LE: loop exit
PB: predicated region body
PF: predicated region fallthrough
CT: control target
= control target key end

     0   :  { %s1822_s21 = smov 0   ;;  %s2217_s0 = inlined_call_operand.vmem [shape: f32[2,8,256], index: 0, kind: input, shape index: {}]   ;;  %s2218_s1 = inlined_call_operand.vmem [shape: f32[9,1,256], index: 1, kind: input, shape index: {}]   ;;  %s2219_s2 = inlined_call_operand.vmem [shape: bf16[9,8,8], index: 2, kind: input, shape index: {}]   ;;  %s2220_s3 = inlined_call_operand.vmem [shape: f32[8,1], index: 3, kind: input, shape index: {}]   ;;  %s2221_s4 = inlined_call_operand.vmem [shape: bf16[9,8,8], index: 4, kind: input, shape index: {}]   ;;  %s2222_s5 = inlined_call_operand.vmem [shape: f32[8,1], index: 5, kind: input, shape index: {}]   ;;  %s2223_s6 = inlined_call_operand.vmem [shape: f32[2,8,256], index: 6, kind: output, shape index: {}]  }
   0x1 LB: > { %s1673_s22 = sadd.s32 4294967295, %s1776_s21   ;;  %p1677_p0 = scmp.ge.s32.totalorder %s1776_s21, 1  ;;  %s1776_s21 = sphi %s1822_s21, %s16_s21  }
   0x2   : > { %p212_p1 = scmp.lt.s32.totalorder %s1776_s21, 3 }
   0x4   : > { %p213_p2 = pnand %p1677_p0, %p212_p1 }
   0x5   : > { %p242_p3 = scmp.lt.s32.totalorder (!%p213_p2), %s1673_s22, 1  ;;  %s1779_s27 = smov (!%p213_p2), 17  }
   0x6   : > { %216 = sbr.rel (%p213_p2) target bundleno = 736 (0x2e0), region = 44  ;;  %s1780_s28 = smov (!%p213_p2), 16  }
   0x7   : > { %s1781_s29 = smov (!%p213_p2), 15   ;;  %s1782_s30 = smov (!%p213_p2), 1  }
   0x8   : > { %s1783_s7 = smov (!%p213_p2), 127   ;;  %s1784_s8 = smov (!%p213_p2), 113  }
   0x9   : > { %s1785_s9 = smov (!%p213_p2), 112   ;;  %s1786_s10 = smov (!%p213_p2), 111  }
   0xb   : > { %s2225_s22 = smov (!%p242_p3, %s1673_s22), 1  ;;  %v1778_v1 = vmov 0   ;;  %v933_v3 = vld [vmem:[%s2220_s3] sm:$0xff]  ;;  %v259_v4 = vlaneseq  ;;  %vm311_vm3 = vcmask 1043456   ;;  %v1699_v45 = vld [vmem:[%s2218_s1 + $0xa] sm:$0x3] }
   0xc   : > { %s1750_s23 = sshll.u32 %s2225_s22, 4  ;;  %350 = vmatprep.mubr.bf16.mxu0 %v1778_v1  ;;  %400 = vmatprep.mubr.bf16.mxu1 %v1778_v1  ;;  %v264_v9 = vld [vmem:[%s2218_s1] sm:$0x3]  ;;  %v1682_v10 = vld [vmem:[%s2218_s1 + $0x2] sm:$0x3]  ;;  %vm307_vm5 = vcmask 64512  }
   0xd   : > { %s246_s26 = scalar_lea.vmem %s2217_s0, %s1750_s23  ;;  %1769 = vset.pattern.permute.xlu0 %v1778_v1  ;;  %v267_v5 = vshrl.u32 %v259_v4, 7  ;;  %v1880_v6 = vand.u32 127, %v259_v4  ;;  %v1688_v13 = vld [vmem:[%s2218_s1 + $0x4] sm:$0x3]  ;;  %v1692_v30 = vld [vmem:[%s2218_s1 + $0x6] sm:$0x3]  ;;  %s251_s17 = scalar_lea.vmem %s2223_s6, %s1750_s23 }
   0xe   : > { %v1838_v0 = vld [vmem:[%s246_s26] sm:$0xff]  ;;  %v1845_v2 = vld [vmem:[%s246_s26 + $0x8] sm:$0xff] }
   0xf   : > { %255 = vrot.lane.b32.xlu1 %v1838_v0, %s1779_s27  ;;  %281 = vrot.lane.b32.xlu0 %v1838_v0, %s1780_s28  ;;  %v1882_v7 = vsub.s32 0, %v267_v5  ;;  %v1884_v8 = vsub.s32 1, %v267_v5  ;;  %vm261_vm0 = vcmp.lt.s32.totalorder %v1880_v6, 17  ;;  %vm285_vm1 = vcmp.lt.s32.totalorder %v1880_v6, 16  ;;  %v1683_v46 = vld [vmem:[%s2219_s2 + $0x4] sm:$0xf] }
  0x10   : > { %vm413_vm2 = vcmp.lt.s32.totalorder %v1880_v6, 15  ;;  %vm491_vm4 = vcmp.lt.s32.totalorder %v1880_v6, 1  ;;  %v278_v47 = vld [vmem:[%s2219_s2] sm:$0xf]  ;;  %vm625_vm6 = vcmp.lt.s32.totalorder %v1880_v6, 127  ;;  %v568_v55 = vpack.c.bf16 %v1845_v2, %v1845_v2 }
  0x11   : > { %v269_v14 = vrot.slane %v264_v9, %v1882_v7  ;;  %v294_v15 = vrot.slane %v1682_v10, %v1882_v7  ;;  %v298_v16 = vrot.slane %v1682_v10, %v1884_v8  ;;  %v273_v17 = vrot.slane %v264_v9, %v1884_v8  ;;  %v1703_v60 = vld [vmem:[%s2218_s1 + $0xc] sm:$0x3] }
  0x12   : > { %v422_v20 = vrot.slane %v1688_v13, %v1882_v7  ;;  %v426_v21 = vrot.slane %v1688_v13, %v1884_v8  ;;  %v500_v39 = vrot.slane %v1692_v30, %v1882_v7  ;;  %v504_v40 = vrot.slane %v1692_v30, %v1884_v8  ;;  %v1707_v13 = vld [vmem:[%s2218_s1 + $0xe] sm:$0x3] }
  0x13   : > { %257 = vrot.lane.b32.xlu1 %v1845_v2, %s1779_s27  ;;  %283 = vrot.lane.b32.xlu0 %v1845_v2, %s1780_s28  ;;  %v634_v54 = vrot.slane %v1699_v45, %v1882_v7  ;;  %v638_v59 = vrot.slane %v1699_v45, %v1884_v8  ;;  %vm703_vm7 = vcmp.lt.s32.totalorder %v1880_v6, 113  ;;  %v712_v9 = vrot.slane %v1703_v60, %v1882_v7 }
  0x14   : > { %vm781_vm8 = vcmp.lt.s32.totalorder %v1880_v6, 112  ;;  %vm859_vm9 = vcmp.lt.s32.totalorder %v1880_v6, 111 }
  0x17   : > { %411 = vrot.lane.b32.xlu1 %v1845_v2, %s1781_s29  ;;  %409 = vrot.lane.b32.xlu0 %v1838_v0, %s1781_s29 }
  0x1b   : > { %489 = vrot.lane.b32.xlu1 %v1845_v2, %s1782_s30  ;;  %487 = vrot.lane.b32.xlu0 %v1838_v0, %s1782_s30 }
  0x1f   : > { %623 = vrot.lane.b32.xlu1 %v1845_v2, %s1783_s7  ;;  %621 = vrot.lane.b32.xlu0 %v1838_v0, %s1783_s7 }
  0x23   : > { %701 = vrot.lane.b32.xlu1 %v1845_v2, %s1784_s8  ;;  %699 = vrot.lane.b32.xlu0 %v1838_v0, %s1784_s8 }
  0x27   : > { %779 = vrot.lane.b32.xlu1 %v1845_v2, %s1785_s9  ;;  %777 = vrot.lane.b32.xlu0 %v1838_v0, %s1785_s9 }
  0x2b   : > { %857 = vrot.lane.b32.xlu1 %v1845_v2, %s1786_s10  ;;  %855 = vrot.lane.b32.xlu0 %v1838_v0, %s1786_s10 }
  0x2f   : > { %936 = vperm.xlu0 %1769, %v933_v3   ;;  %v567_v3 = vpack.c.bf16 %v1838_v0, %v1838_v0  ;;  %v716_v0 = vrot.slane %v1703_v60, %v1884_v8 }
  0x81   : > { %v256_v11 = vpop.permute.xlu1 %255  ;;  %v282_v12 = vpop.permute.xlu0 %281 }
  0x85   : > { %v258_v18 = vpop.permute.xlu1 %257  ;;  %v284_v19 = vpop.permute.xlu0 %283 }
  0x86   : > { %v262_v22 = vsel %vm261_vm0, %v256_v11, %v258_v18  ;;  %v263_v23 = vsel %vm261_vm0, %v258_v18, %v256_v11  ;;  %v286_v24 = vsel %vm285_vm1, %v282_v12, %v284_v19  ;;  %v287_v25 = vsel %vm285_vm1, %v284_v19, %v282_v12 }
  0x87   : > { %v276_v26 = vmul.f32 %v269_v14, %v263_v23  ;;  %v301_v27 = vmul.f32 %v294_v15, %v287_v25  ;;  %v302_v28 = vmul.f32 %v298_v16, %v286_v24  ;;  %v277_v29 = vmul.f32 %v273_v17, %v262_v22  ;;  %v1689_v14 = vld [vmem:[%s2219_s2 + $0x8] sm:$0xf]  ;;  %v1693_v15 = vld [vmem:[%s2219_s2 + $0xc] sm:$0xf] }
  0x88   : > { %v790_v23 = vrot.slane %v1707_v13, %v1882_v7 }
  0x89   : > { %v412_v31 = vpop.permute.xlu1 %411  ;;  %v410_v32 = vpop.permute.xlu0 %409  ;;  %v306_v33 = vpack.c.bf16 %v302_v28, %v302_v28  ;;  %v280_v34 = vpack.c.bf16 %v277_v29, %v277_v29  ;;  %v305_v35 = vpack.c.bf16 %v301_v27, %v301_v27  ;;  %v279_v36 = vpack.c.bf16 %v276_v26, %v276_v26  ;;  %v1711_v28 = vld [vmem:[%s2218_s1 + $0x10] sm:$0x3] }
  0x8a   : > { %v414_v37 = vsel %vm413_vm2, %v410_v32, %v412_v31  ;;  %v415_v38 = vsel %vm413_vm2, %v412_v31, %v410_v32  ;;  %v794_v27 = vrot.slane %v1707_v13, %v1884_v8 }
  0x8b   : > { %v429_v41 = vmul.f32 %v422_v20, %v415_v38  ;;  %v430_v42 = vmul.f32 %v426_v21, %v414_v37  ;;  %1684 = vmatprep.subr.msk.bf16.mxu0 %vm311_vm3, %v306_v33  ;;  %1686 = vmatprep.subr.msk.bf16.mxu1 %vm311_vm3, %v280_v34  ;;  %v313_v43 = vsel %vm311_vm3, %v305_v35, 0  ;;  %v363_v44 = vsel %vm311_vm3, %v279_v36, 0 }
  0x8c   : > { %333 = vmatpush1.bf16.msra.mxu0 %v313_v43  ;;  %383 = vmatpush1.bf16.msra.mxu1 %v363_v44  ;;  %v573_v20 = vsel %vm311_vm3, %v567_v3, 0  ;;  %v868_v37 = vrot.slane %v1711_v28, %v1882_v7  ;;  %v872_v38 = vrot.slane %v1711_v28, %v1884_v8 }
  0x8d   : > { %v433_v48 = vpack.c.bf16 %v429_v41, %v429_v41  ;;  %v434_v49 = vpack.c.bf16 %v430_v42, %v430_v42  ;;  %v490_v50 = vpop.permute.xlu1 %489  ;;  %v488_v51 = vpop.permute.xlu0 %487 }
  0x8e   : > { %v492_v52 = vsel %vm491_vm4, %v488_v51, %v490_v50  ;;  %v493_v53 = vsel %vm491_vm4, %v490_v50, %v488_v51 }
  0x8f   : > { %v507_v56 = vmul.f32 %v500_v39, %v493_v53  ;;  %v508_v57 = vmul.f32 %v504_v40, %v492_v52  ;;  %1685 = vmatmul.mubr.msk.bf16.vlgmr.msra.gmra.mxu0 %vm307_vm5, %v1683_v46  ;;  %1687 = vmatmul.mubr.msk.bf16.vlgmr.msra.gmra.mxu1 %vm307_vm5, %v278_v47  ;;  %v439_v58 = vsel %vm311_vm3, %v433_v48, 0  ;;  %v1696_v39 = vld [vmem:[%s2219_s2 + $0x10] sm:$0xf]  ;;  %v1700_v40 = vld [vmem:[%s2219_s2 + $0x14] sm:$0xf] }
  0x90   : > { %1690 = vmatprep.subr.msk.bf16.mxu0 %vm311_vm3, %v434_v49  ;;  %476 = vmatprep.mubr.bf16.mxu0 %v1778_v1  ;;  %v1704_v53 = vld [vmem:[%s2219_s2 + $0x18] sm:$0xf] }
  0x91   : > { %v511_v61 = vpack.c.bf16 %v507_v56, %v507_v56  ;;  %v512_v62 = vpack.c.bf16 %v508_v57, %v508_v57  ;;  %459 = vmatpush1.bf16.msra.mxu0 %v439_v58  ;;  %v624_v63 = vpop.permute.xlu1 %623  ;;  %v622_v2 = vpop.permute.xlu0 %621  ;;  %554 = vmatprep.mubr.bf16.mxu1 %v1778_v1  ;;  %v1712_v56 = vld [vmem:[%s2219_s2 + $0x20] sm:$0xf] }
  0x92   : > { %v626_v4 = vsel %vm625_vm6, %v622_v2, %v624_v63  ;;  %v627_v5 = vsel %vm625_vm6, %v624_v63, %v622_v2  ;;  %1697 = vmatprep.subr.msk.bf16.mxu0 %vm311_vm3, %v568_v55 }
  0x93   : > { %1694 = vmatprep.subr.msk.bf16.mxu1 %vm311_vm3, %v512_v62  ;;  %v517_v10 = vsel %vm311_vm3, %v511_v61, 0  ;;  %v641_v11 = vmul.f32 %v634_v54, %v626_v4  ;;  %v642_v12 = vmul.f32 %v638_v59, %v627_v5  ;;  %v1708_v54 = vld [vmem:[%s2219_s2 + $0x1c] sm:$0xf] }
  0x94   : > { %537 = vmatpush1.bf16.msra.mxu1 %v517_v10 }
  0x95   : > { %v645_v16 = vpack.c.bf16 %v641_v11, %v641_v11  ;;  %v646_v17 = vpack.c.bf16 %v642_v12, %v642_v12  ;;  %v702_v18 = vpop.permute.xlu1 %701  ;;  %v700_v19 = vpop.permute.xlu0 %699 }
  0x96   : > { %v704_v21 = vsel %vm703_vm7, %v700_v19, %v702_v18  ;;  %v705_v22 = vsel %vm703_vm7, %v702_v18, %v700_v19 }
  0x97   : > { %1691 = vmatmul.mubr.msk.bf16.vlgmr.msra.gmra.mxu0 %vm307_vm5, %v1689_v14  ;;  %1695 = vmatmul.mubr.msk.bf16.vlgmr.msra.gmra.mxu1 %vm307_vm5, %v1693_v15  ;;  %v719_v24 = vmul.f32 %v712_v9, %v704_v21  ;;  %v720_v25 = vmul.f32 %v716_v0, %v705_v22  ;;  %v651_v26 = vsel %vm311_vm3, %v645_v16, 0 }
  0x98   : > { %1701 = vmatprep.subr.msk.bf16.mxu1 %vm311_vm3, %v646_v17  ;;  %593 = vmatpush1.bf16.msra.mxu0 %v573_v20 }
  0x99   : > { %v723_v29 = vpack.c.bf16 %v719_v24, %v719_v24  ;;  %v724_v30 = vpack.c.bf16 %v720_v25, %v720_v25  ;;  %671 = vmatpush1.bf16.msra.mxu1 %v651_v26  ;;  %v780_v31 = vpop.permute.xlu1 %779  ;;  %v778_v32 = vpop.permute.xlu0 %777  ;;  %610 = vmatprep.mubr.bf16.mxu0 %v1778_v1 }
  0x9a   : > { %v782_v33 = vsel %vm781_vm8, %v778_v32, %v780_v31  ;;  %v783_v34 = vsel %vm781_vm8, %v780_v31, %v778_v32  ;;  %688 = vmatprep.mubr.bf16.mxu1 %v1778_v1 }
  0x9b   : > { %v797_v35 = vmul.f32 %v790_v23, %v782_v33  ;;  %v798_v36 = vmul.f32 %v794_v27, %v783_v34  ;;  %1705 = vmatprep.subr.msk.bf16.mxu0 %vm311_vm3, %v724_v30  ;;  %v729_v43 = vsel %vm311_vm3, %v723_v29, 0 }
  0x9d   : > { %v801_v41 = vpack.c.bf16 %v797_v35, %v797_v35  ;;  %v802_v42 = vpack.c.bf16 %v798_v36, %v798_v36  ;;  %v858_v44 = vpop.permute.xlu1 %857  ;;  %v856_v45 = vpop.permute.xlu0 %855 }
  0x9e   : > { %v860_v46 = vsel %vm859_vm9, %v856_v45, %v858_v44  ;;  %v861_v47 = vsel %vm859_vm9, %v858_v44, %v856_v45 }
  0x9f   : > { %1698 = vmatmul.mubr.msk.bf16.vlgmr.msra.gmra.mxu0 %vm307_vm5, %v1696_v39  ;;  %1702 = vmatmul.mubr.msk.bf16.vlgmr.msra.gmra.mxu1 %vm307_vm5, %v1700_v40  ;;  %v807_v48 = vsel %vm311_vm3, %v801_v41, 0  ;;  %v875_v49 = vmul.f32 %v868_v37, %v860_v46  ;;  %v876_v50 = vmul.f32 %v872_v38, %v861_v47 }
  0xa0   : > { %1709 = vmatprep.subr.msk.bf16.mxu1 %vm311_vm3, %v802_v42  ;;  %749 = vmatpush1.bf16.msra.mxu0 %v729_v43 }
  0xa1   : > { %827 = vmatpush1.bf16.msra.mxu1 %v807_v48  ;;  %v879_v51 = vpack.c.bf16 %v875_v49, %v875_v49  ;;  %v880_v52 = vpack.c.bf16 %v876_v50, %v876_v50  ;;  %766 = vmatprep.mubr.bf16.mxu0 %v1778_v1 }
  0xa2   : > { %844 = vmatprep.mubr.bf16.mxu1 %v1778_v1 }
  0xa3   : > { %1713 = vmatprep.subr.msk.bf16.mxu0 %vm311_vm3, %v880_v52  ;;  %v885_v55 = vsel %vm311_vm3, %v879_v51, 0 }
  0xa7   : > { %1706 = vmatmul.mubr.msk.bf16.vlgmr.msra.gmra.mxu0 %vm307_vm5, %v1704_v53  ;;  %1710 = vmatmul.mubr.msk.bf16.vlgmr.msra.gmra.mxu1 %vm307_vm5, %v1708_v54  ;;  %v1606_v54 = vld [vmem:[%s2222_s5] sm:$0xff] }
  0xa8   : > { %905 = vmatpush1.bf16.msra.mxu0 %v885_v55  ;;  %922 = vmatprep.mubr.bf16.mxu0 %v1778_v1  ;;  %v1715_v55 = vld [vmem:[%s2218_s1 + $0x2] sm:$0x3] }
  0xa9   : > { %1035 = vmatprep.mubr.bf16.mxu1 %v1778_v1 }
  0xaa   : > { %v937_v43 = vpop.permute.xlu0 %936 }
  0xaf   : > { %1714 = vmatmul.mubr.msk.bf16.vlgmr.msra.gmra.mxu0 %vm307_vm5, %v1712_v56 }
  0xb0   : > { %1085 = vmatprep.mubr.bf16.mxu0 %v1778_v1 }
 0x14f   : > { %v352_v57 = vpop.f32.mrf.mxu0  ;;  %v402_v58 = vpop.f32.mrf.mxu1 }
 0x150   : > { %v403_v12 = vadd.f32 %v402_v58, %v352_v57  ;;  %v981_v58 = vrot.slane %v1715_v55, %v1882_v7 }
 0x151   : > { %v354_v59 = vpop.f32.mrf.mxu0  ;;  %v404_v60 = vpop.f32.mrf.mxu1 }
 0x152   : > { %v405_v14 = vadd.f32 %v404_v60, %v354_v59  ;;  %v985_v59 = vrot.slane %v1715_v55, %v1884_v8  ;;  %v953_v60 = vld [vmem:[%s2218_s1] sm:$0x3] }
 0x153   : > { %v356_v61 = vpop.f32.mrf.mxu0  ;;  %v406_v62 = vpop.f32.mrf.mxu1 }
 0x155   : > { %v357_v63 = vpop.f32.mrf.mxu0  ;;  %v407_v2 = vpop.f32.mrf.mxu1 }
 0x157   : > { %v478_v3 = vpop.f32.mrf.mxu0  ;;  %v556_v4 = vpop.f32.mrf.mxu1 }
 0x158   : > { %v485_v15 = vadd.f32 %v478_v3, %v403_v12 }
 0x159   : > { %v480_v5 = vpop.f32.mrf.mxu0  ;;  %v558_v9 = vpop.f32.mrf.mxu1 }
 0x15a   : > { %v486_v18 = vadd.f32 %v480_v5, %v405_v14  ;;  %v563_v21 = vadd.f32 %v556_v4, %v485_v15  ;;  %v958_v5 = vrot.slane %v953_v60, %v1882_v7 }
 0x15b   : > { %v482_v10 = vpop.f32.mrf.mxu0  ;;  %v560_v11 = vpop.f32.mrf.mxu1 }
 0x15c   : > { %v564_v24 = vadd.f32 %v558_v9, %v486_v18  ;;  %v962_v9 = vrot.slane %v953_v60, %v1884_v8  ;;  %v1721_v10 = vld [vmem:[%s2218_s1 + $0x4] sm:$0x3] }
 0x15d   : > { %v483_v0 = vpop.f32.mrf.mxu0  ;;  %v561_v13 = vpop.f32.mrf.mxu1 }
 0x15f   : > { %v612_v16 = vpop.f32.mrf.mxu0  ;;  %v690_v17 = vpop.f32.mrf.mxu1 }
 0x160   : > { %v619_v25 = vadd.f32 %v612_v16, %v563_v21  ;;  %v1105_v16 = vrot.slane %v1721_v10, %v1882_v7  ;;  %v1725_v21 = vld [vmem:[%s2218_s1 + $0x6] sm:$0x3] }
 0x161   : > { %v614_v19 = vpop.f32.mrf.mxu0  ;;  %v692_v20 = vpop.f32.mrf.mxu1 }
 0x162   : > { %v620_v28 = vadd.f32 %v614_v19, %v564_v24  ;;  %v697_v31 = vadd.f32 %v690_v17, %v619_v25 }
 0x163   : > { %v616_v22 = vpop.f32.mrf.mxu0  ;;  %v694_v23 = vpop.f32.mrf.mxu1 }
 0x164   : > { %v698_v34 = vadd.f32 %v692_v20, %v620_v28  ;;  %v1109_v20 = vrot.slane %v1721_v10, %v1884_v8  ;;  %v1716_v22 = vld [vmem:[%s2221_s4 + $0x4] sm:$0xf]  ;;  %v1181_v28 = vrot.slane %v1725_v21, %v1882_v7 }
 0x165   : > { %v617_v26 = vpop.f32.mrf.mxu0  ;;  %v695_v27 = vpop.f32.mrf.mxu1 }
 0x167   : > { %v768_v29 = vpop.f32.mrf.mxu0  ;;  %v846_v30 = vpop.f32.mrf.mxu1 }
 0x168   : > { %v775_v35 = vadd.f32 %v768_v29, %v697_v31 }
 0x169   : > { %v770_v32 = vpop.f32.mrf.mxu0  ;;  %v848_v33 = vpop.f32.mrf.mxu1 }
 0x16a   : > { %v776_v38 = vadd.f32 %v770_v32, %v698_v34  ;;  %v853_v41 = vadd.f32 %v846_v30, %v775_v35  ;;  %v1732_v34 = vld [vmem:[%s2218_s1 + $0xa] sm:$0x3]  ;;  %v967_v35 = vld [vmem:[%s2221_s4] sm:$0xf] }
 0x16b   : > { %v772_v36 = vpop.f32.mrf.mxu0  ;;  %v850_v37 = vpop.f32.mrf.mxu1 }
 0x16c   : > { %v854_v44 = vadd.f32 %v848_v33, %v776_v38  ;;  %v1185_v33 = vrot.slane %v1725_v21, %v1884_v8 }
 0x16d   : > { %v773_v39 = vpop.f32.mrf.mxu0  ;;  %v851_v40 = vpop.f32.mrf.mxu1 }
 0x16f   : > { %v924_v42 = vpop.f32.mrf.mxu0 }
 0x170   : > { %v931_v45 = vadd.f32 %v924_v42, %v853_v41  ;;  %v1313_v42 = vrot.slane %v1732_v34, %v1882_v7 }
 0x171   : > { %v926_v46 = vpop.f32.mrf.mxu0 }
 0x172   : > { %v939_v47 = vadd.f32 %v937_v43, %v931_v45  ;;  %v932_v48 = vadd.f32 %v926_v46, %v854_v44 }
 0x173   : > { %v928_v49 = vpop.f32.mrf.mxu0 }
 0x174   : > { %v2033_v50 = vmax.f32 %v939_v47, 0.0  ;;  %v940_v51 = vadd.f32 %v937_v43, %v932_v48  ;;  %v1317_v47 = vrot.slane %v1732_v34, %v1884_v8  ;;  %v1736_v48 = vld [vmem:[%s2218_s1 + $0xc] sm:$0x3]  ;;  %v1722_v49 = vld [vmem:[%s2221_s4 + $0x8] sm:$0xf] }
 0x175   : > { %v929_v52 = vpop.f32.mrf.mxu0 }
 0x176   : > { %947 = vrot.lane.b32.xlu0 %v2033_v50, %s1779_s27  ;;  %970 = vrot.lane.b32.xlu1 %v2033_v50, %s1780_s28  ;;  %v2039_v53 = vmax.f32 %v940_v51, 0.0  ;;  %v1248_v39 = vpack.c.bf16 %v2033_v50, %v2033_v50 }
 0x178   : > { %v1249_v43 = vpack.c.bf16 %v2039_v53, %v2039_v53 }
 0x17a   : > { %1094 = vrot.lane.b32.xlu0 %v2033_v50, %s1781_s29  ;;  %972 = vrot.lane.b32.xlu1 %v2039_v53, %s1780_s28 }
 0x17e   : > { %1170 = vrot.lane.b32.xlu0 %v2033_v50, %s1782_s30  ;;  %949 = vrot.lane.b32.xlu1 %v2039_v53, %s1779_s27 }
 0x182   : > { %1302 = vrot.lane.b32.xlu0 %v2033_v50, %s1783_s7  ;;  %1096 = vrot.lane.b32.xlu1 %v2039_v53, %s1781_s29 }
 0x186   : > { %1378 = vrot.lane.b32.xlu0 %v2033_v50, %s1784_s8  ;;  %1172 = vrot.lane.b32.xlu1 %v2039_v53, %s1782_s30 }
 0x18a   : > { %1454 = vrot.lane.b32.xlu0 %v2033_v50, %s1785_s9  ;;  %1304 = vrot.lane.b32.xlu1 %v2039_v53, %s1783_s7 }
 0x18e   : > { %1530 = vrot.lane.b32.xlu0 %v2033_v50, %s1786_s10  ;;  %1380 = vrot.lane.b32.xlu1 %v2039_v53, %s1784_s8 }
 0x192   : > { %1609 = vperm.xlu0 %1769, %v1606_v54   ;;  %1456 = vrot.lane.b32.xlu1 %v2039_v53, %s1785_s9 }
 0x196   : > { %1532 = vrot.lane.b32.xlu1 %v2039_v53, %s1786_s10 }
 0x1e8   : > { %v948_v56 = vpop.permute.xlu0 %947  ;;  %v971_v57 = vpop.permute.xlu1 %970 }
 0x1ec   : > { %v1095_v61 = vpop.permute.xlu0 %1094  ;;  %v973_v62 = vpop.permute.xlu1 %972 }
 0x1ed   : > { %v974_v63 = vsel %vm285_vm1, %v971_v57, %v973_v62  ;;  %v975_v2 = vsel %vm285_vm1, %v973_v62, %v971_v57  ;;  %v1389_v57 = vrot.slane %v1736_v48, %v1882_v7  ;;  %v1740_v62 = vld [vmem:[%s2218_s1 + $0xe] sm:$0x3] }
 0x1ee   : > { %v988_v3 = vmul.f32 %v981_v58, %v975_v2  ;;  %v989_v4 = vmul.f32 %v985_v59, %v974_v63  ;;  %v1726_v63 = vld [vmem:[%s2221_s4 + $0xc] sm:$0xf]  ;;  %v1465_v10 = vrot.slane %v1740_v62, %v1882_v7 }
 0x1f0   : > { %v992_v11 = vpack.c.bf16 %v988_v3, %v988_v3  ;;  %v993_v12 = vpack.c.bf16 %v989_v4, %v989_v4  ;;  %v1171_v0 = vpop.permute.xlu0 %1170  ;;  %v950_v13 = vpop.permute.xlu1 %949 }
 0x1f1   : > { %v951_v14 = vsel %vm261_vm0, %v948_v56, %v950_v13  ;;  %v952_v15 = vsel %vm261_vm0, %v950_v13, %v948_v56  ;;  %v1254_v56 = vsel %vm311_vm3, %v1248_v39, 0  ;;  %v1745_v39 = vld [vmem:[%s2221_s4 + $0x20] sm:$0xf] }
 0x1f2   : > { %v965_v17 = vmul.f32 %v958_v5, %v952_v15  ;;  %v966_v18 = vmul.f32 %v962_v9, %v951_v14  ;;  %1717 = vmatprep.subr.msk.bf16.mxu1 %vm311_vm3, %v993_v12  ;;  %v998_v19 = vsel %vm311_vm3, %v992_v11, 0  ;;  %v1469_v14 = vrot.slane %v1740_v62, %v1884_v8  ;;  %v1744_v15 = vld [vmem:[%s2218_s1 + $0x10] sm:$0x3] }
 0x1f3   : > { %1018 = vmatpush1.bf16.msra.mxu1 %v998_v19 }
 0x1f4   : > { %v968_v23 = vpack.c.bf16 %v965_v17, %v965_v17  ;;  %v969_v24 = vpack.c.bf16 %v966_v18, %v966_v18  ;;  %v1097_v25 = vpop.permute.xlu1 %1096  ;;  %v1303_v29 = vpop.permute.xlu0 %1302 }
 0x1f5   : > { %v1098_v26 = vsel %vm413_vm2, %v1095_v61, %v1097_v25  ;;  %v1099_v27 = vsel %vm413_vm2, %v1097_v25, %v1095_v61  ;;  %v1393_v61 = vrot.slane %v1736_v48, %v1884_v8 }
 0x1f6   : > { %v1112_v30 = vmul.f32 %v1105_v16, %v1099_v27  ;;  %v1113_v31 = vmul.f32 %v1109_v20, %v1098_v26  ;;  %1718 = vmatmul.mubr.msk.bf16.vlgmr.msra.gmra.mxu1 %vm307_vm5, %v1716_v22  ;;  %1719 = vmatprep.subr.msk.bf16.mxu0 %vm311_vm3, %v969_v24  ;;  %v1048_v32 = vsel %vm311_vm3, %v968_v23, 0  ;;  %v1729_v16 = vld [vmem:[%s2221_s4 + $0x10] sm:$0xf]  ;;  %v1541_v22 = vrot.slane %v1744_v15, %v1882_v7  ;;  %v1733_v27 = vld [vmem:[%s2221_s4 + $0x14] sm:$0xf] }
 0x1f7   : > { %1068 = vmatpush1.bf16.msra.mxu0 %v1048_v32  ;;  %1159 = vmatprep.mubr.bf16.mxu1 %v1778_v1  ;;  %v1545_v26 = vrot.slane %v1744_v15, %v1884_v8 }
 0x1f8   : > { %v1116_v36 = vpack.c.bf16 %v1112_v30, %v1112_v30  ;;  %v1117_v37 = vpack.c.bf16 %v1113_v31, %v1113_v31  ;;  %v1173_v38 = vpop.permute.xlu1 %1172  ;;  %v1379_v50 = vpop.permute.xlu0 %1378 }
 0x1f9   : > { %v1174_v40 = vsel %vm491_vm4, %v1171_v0, %v1173_v38  ;;  %v1175_v41 = vsel %vm491_vm4, %v1173_v38, %v1171_v0  ;;  %v1741_v38 = vld [vmem:[%s2221_s4 + $0x1c] sm:$0xf] }
 0x1fa   : > { %v1188_v44 = vmul.f32 %v1181_v28, %v1175_v41  ;;  %v1189_v45 = vmul.f32 %v1185_v33, %v1174_v40  ;;  %1720 = vmatmul.mubr.msk.bf16.vlgmr.msra.gmra.mxu0 %vm307_vm5, %v967_v35  ;;  %1723 = vmatprep.subr.msk.bf16.mxu1 %vm311_vm3, %v1117_v37  ;;  %v1122_v46 = vsel %vm311_vm3, %v1116_v36, 0  ;;  %v1737_v35 = vld [vmem:[%s2221_s4 + $0x18] sm:$0xf] }
 0x1fb   : > { %1142 = vmatpush1.bf16.msra.mxu1 %v1122_v46  ;;  %1235 = vmatprep.mubr.bf16.mxu0 %v1778_v1 }
 0x1fc   : > { %v1192_v51 = vpack.c.bf16 %v1188_v44, %v1188_v44  ;;  %v1193_v52 = vpack.c.bf16 %v1189_v45, %v1189_v45  ;;  %v1305_v53 = vpop.permute.xlu1 %1304  ;;  %1730 = vmatprep.subr.msk.bf16.mxu1 %vm311_vm3, %v1249_v43  ;;  %v1455_v11 = vpop.permute.xlu0 %1454 }
 0x1fd   : > { %v1306_v54 = vsel %vm625_vm6, %v1303_v29, %v1305_v53  ;;  %v1307_v55 = vsel %vm625_vm6, %v1305_v53, %v1303_v29 }
 0x1fe   : > { %v1320_v58 = vmul.f32 %v1313_v42, %v1306_v54  ;;  %v1321_v59 = vmul.f32 %v1317_v47, %v1307_v55  ;;  %1724 = vmatmul.mubr.msk.bf16.vlgmr.msra.gmra.mxu1 %vm307_vm5, %v1722_v49  ;;  %1727 = vmatprep.subr.msk.bf16.mxu0 %vm311_vm3, %v1193_v52  ;;  %v1198_v60 = vsel %vm311_vm3, %v1192_v51, 0 }
 0x1ff   : > { %1218 = vmatpush1.bf16.msra.mxu0 %v1198_v60  ;;  %1274 = vmatpush1.bf16.msra.mxu1 %v1254_v56 }
 0x200   : > { %v1324_v2 = vpack.c.bf16 %v1320_v58, %v1320_v58  ;;  %v1325_v3 = vpack.c.bf16 %v1321_v59, %v1321_v59  ;;  %v1381_v4 = vpop.permute.xlu1 %1380  ;;  %1291 = vmatprep.mubr.bf16.mxu1 %v1778_v1  ;;  %v1531_v28 = vpop.permute.xlu0 %1530 }
 0x201   : > { %v1382_v5 = vsel %vm703_vm7, %v1379_v50, %v1381_v4  ;;  %v1383_v9 = vsel %vm703_vm7, %v1381_v4, %v1379_v50 }
 0x202   : > { %v1396_v12 = vmul.f32 %v1389_v57, %v1382_v5  ;;  %v1397_v0 = vmul.f32 %v1393_v61, %v1383_v9  ;;  %1728 = vmatmul.mubr.msk.bf16.vlgmr.msra.gmra.mxu0 %vm307_vm5, %v1726_v63  ;;  %1734 = vmatprep.subr.msk.bf16.mxu0 %vm311_vm3, %v1325_v3  ;;  %v1330_v13 = vsel %vm311_vm3, %v1324_v2, 0 }
 0x203   : > { %1350 = vmatpush1.bf16.msra.mxu0 %v1330_v13  ;;  %1367 = vmatprep.mubr.bf16.mxu0 %v1778_v1 }
 0x204   : > { %v1400_v17 = vpack.c.bf16 %v1396_v12, %v1396_v12  ;;  %v1401_v18 = vpack.c.bf16 %v1397_v0, %v1397_v0  ;;  %v1457_v19 = vpop.permute.xlu1 %1456 }
 0x205   : > { %v1458_v20 = vsel %vm781_vm8, %v1455_v11, %v1457_v19  ;;  %v1459_v21 = vsel %vm781_vm8, %v1457_v19, %v1455_v11 }
 0x206   : > { %v1472_v23 = vmul.f32 %v1465_v10, %v1458_v20  ;;  %v1473_v24 = vmul.f32 %v1469_v14, %v1459_v21  ;;  %1731 = vmatmul.mubr.msk.bf16.vlgmr.msra.gmra.mxu1 %vm307_vm5, %v1729_v16  ;;  %1738 = vmatprep.subr.msk.bf16.mxu1 %vm311_vm3, %v1401_v18  ;;  %v1406_v25 = vsel %vm311_vm3, %v1400_v17, 0 }
 0x207   : > { %1426 = vmatpush1.bf16.msra.mxu1 %v1406_v25  ;;  %1443 = vmatprep.mubr.bf16.mxu1 %v1778_v1 }
 0x208   : > { %v1476_v29 = vpack.c.bf16 %v1472_v23, %v1472_v23  ;;  %v1477_v7 = vpack.c.bf16 %v1473_v24, %v1473_v24  ;;  %v1533_v30 = vpop.permute.xlu1 %1532 }
 0x209   : > { %v1534_v31 = vsel %vm859_vm9, %v1531_v28, %v1533_v30  ;;  %v1535_v32 = vsel %vm859_vm9, %v1533_v30, %v1531_v28 }
 0x20a   : > { %v1548_v33 = vmul.f32 %v1541_v22, %v1534_v31  ;;  %v1549_v34 = vmul.f32 %v1545_v26, %v1535_v32  ;;  %1735 = vmatmul.mubr.msk.bf16.vlgmr.msra.gmra.mxu0 %vm307_vm5, %v1733_v27  ;;  %1742 = vmatprep.subr.msk.bf16.mxu0 %vm311_vm3, %v1477_v7  ;;  %v1482_v8 = vsel %vm311_vm3, %v1476_v29, 0 }
 0x20b   : > { %1502 = vmatpush1.bf16.msra.mxu0 %v1482_v8  ;;  %1519 = vmatprep.mubr.bf16.mxu0 %v1778_v1 }
 0x20c   : > { %v1552_v36 = vpack.c.bf16 %v1548_v33, %v1548_v33  ;;  %v1553_v37 = vpack.c.bf16 %v1549_v34, %v1549_v34 }
 0x20d   : > { %v1610_v24 = vpop.permute.xlu0 %1609 }
 0x20e   : > { %1739 = vmatmul.mubr.msk.bf16.vlgmr.msra.gmra.mxu1 %vm307_vm5, %v1737_v35  ;;  %1746 = vmatprep.subr.msk.bf16.mxu1 %vm311_vm3, %v1553_v37  ;;  %v1558_v6 = vsel %vm311_vm3, %v1552_v36, 0 }
 0x20f   : > { %1578 = vmatpush1.bf16.msra.mxu1 %v1558_v6  ;;  %1595 = vmatprep.mubr.bf16.mxu1 %v1778_v1 }
 0x212   : > { %1743 = vmatmul.mubr.msk.bf16.vlgmr.msra.gmra.mxu0 %vm307_vm5, %v1741_v38 }
 0x216   : > { %1747 = vmatmul.mubr.msk.bf16.vlgmr.msra.gmra.mxu1 %vm307_vm5, %v1745_v39 }
 0x2b6   : > { %v1037_v40 = vpop.f32.mrf.mxu1 }
 0x2b8   : > { %v1039_v41 = vpop.f32.mrf.mxu1 }
 0x2ba   : > { %v1041_v42 = vpop.f32.mrf.mxu1  ;;  %v1087_v43 = vpop.f32.mrf.mxu0 }
 0x2bb   : > { %v1088_v57 = vadd.f32 %v1087_v43, %v1037_v40 }
 0x2bc   : > { %v1042_v44 = vpop.f32.mrf.mxu1  ;;  %v1089_v45 = vpop.f32.mrf.mxu0 }
 0x2bd   : > { %v1090_v60 = vadd.f32 %v1089_v45, %v1039_v41 }
 0x2be   : > { %v1091_v46 = vpop.f32.mrf.mxu0  ;;  %v1161_v47 = vpop.f32.mrf.mxu1 }
 0x2bf   : > { %v1168_v61 = vadd.f32 %v1161_v47, %v1088_v57 }
 0x2c0   : > { %v1092_v48 = vpop.f32.mrf.mxu0  ;;  %v1163_v49 = vpop.f32.mrf.mxu1 }
 0x2c1   : > { %v1169_v2 = vadd.f32 %v1163_v49, %v1090_v60 }
 0x2c2   : > { %v1165_v50 = vpop.f32.mrf.mxu1  ;;  %v1237_v1 = vpop.f32.mrf.mxu0 }
 0x2c3   : > { %v1244_v3 = vadd.f32 %v1237_v1, %v1168_v61 }
 0x2c4   : > { %v1166_v51 = vpop.f32.mrf.mxu1  ;;  %v1239_v52 = vpop.f32.mrf.mxu0 }
 0x2c5   : > { %v1245_v9 = vadd.f32 %v1239_v52, %v1169_v2 }
 0x2c6   : > { %v1241_v53 = vpop.f32.mrf.mxu0  ;;  %v1293_v54 = vpop.f32.mrf.mxu1 }
 0x2c7   : > { %v1300_v10 = vadd.f32 %v1293_v54, %v1244_v3 }
 0x2c8   : > { %v1242_v55 = vpop.f32.mrf.mxu0  ;;  %v1295_v56 = vpop.f32.mrf.mxu1 }
 0x2c9   : > { %v1301_v0 = vadd.f32 %v1295_v56, %v1245_v9 }
 0x2ca   : > { %v1297_v58 = vpop.f32.mrf.mxu1  ;;  %v1369_v59 = vpop.f32.mrf.mxu0 }
 0x2cb   : > { %v1376_v13 = vadd.f32 %v1369_v59, %v1300_v10 }
 0x2cc   : > { %v1298_v62 = vpop.f32.mrf.mxu1  ;;  %v1371_v63 = vpop.f32.mrf.mxu0 }
 0x2cd   : > { %v1377_v16 = vadd.f32 %v1371_v63, %v1301_v0 }
 0x2ce   : > { %v1373_v4 = vpop.f32.mrf.mxu0  ;;  %v1445_v5 = vpop.f32.mrf.mxu1 }
 0x2cf   : > { %v1452_v17 = vadd.f32 %v1445_v5, %v1376_v13 }
 0x2d0   : > { %v1374_v11 = vpop.f32.mrf.mxu0  ;;  %v1447_v12 = vpop.f32.mrf.mxu1 }
 0x2d1   : > { %v1453_v20 = vadd.f32 %v1447_v12, %v1377_v16 }
 0x2d2   : > { %v1449_v14 = vpop.f32.mrf.mxu1  ;;  %v1521_v15 = vpop.f32.mrf.mxu0 }
 0x2d3   : > { %v1528_v21 = vadd.f32 %v1521_v15, %v1452_v17 }
 0x2d4   : > { %v1450_v18 = vpop.f32.mrf.mxu1  ;;  %v1523_v19 = vpop.f32.mrf.mxu0 }
 0x2d5   : > { %v1529_v25 = vadd.f32 %v1523_v19, %v1453_v20 }
 0x2d6   : > { %v1597_v22 = vpop.f32.mrf.mxu1  ;;  %v1525_v23 = vpop.f32.mrf.mxu0 }
 0x2d7   : > { %v1604_v26 = vadd.f32 %v1597_v22, %v1528_v21 }
 0x2d8   : > { %v1599_v27 = vpop.f32.mrf.mxu1  ;;  %v1526_v28 = vpop.f32.mrf.mxu0 }
 0x2d9   : > { %v1612_v29 = vadd.f32 %v1610_v24, %v1604_v26  ;;  %v1605_v7 = vadd.f32 %v1599_v27, %v1529_v25 }
 0x2da   : > { %v1601_v30 = vpop.f32.mrf.mxu1 }
 0x2db   : > { %v1614_v31 = vmax.f32 %v1612_v29, 0.0  ;;  %v1613_v32 = vadd.f32 %v1610_v24, %v1605_v7 }
 0x2dc   : > { %v1602_v33 = vpop.f32.mrf.mxu1 }
 0x2dd   : > { %1616 = vst [vmem:[%s251_s17] sm:$0xff] %v1614_v31  ;;  %v1615_v34 = vmax.f32 %v1613_v32, 0.0 }
 0x2df   : > { %1617 = vst [vmem:[%s251_s17 + $0x8] sm:$0xff] %v1615_v34 }
 0x2e0 PF: > { %s16_s21 = sadd.s32 1, %s1776_s21  }
 0x2e1   : > { %p13_p4 = scmp.ge.s32.totalorder %s16_s21, 4  }
 0x2e3   :  { %15 = sbr.rel (!%p13_p4) target bundleno = 1 (0x1), region = 97 }

</bundles_post_ra>
